<compile_context>
chip_gen: v6e
topology: v6e:2x2x1
jax: 0.10.0
libtpu: 0.0.40
codegen_flags: <defaults>
</compile_context>

<pallas_src>
import functools
import math

import numpy as np
import jax
import jax.numpy as jnp
from jax import lax
from jax.experimental import pallas as pl
from jax.experimental.pallas import tpu as pltpu

WINDOW = 7
EMBED_DIM = 128
DEPTHS = (2, 2, 2, 2)          # TODO(synk): real swin-base uses (2, 2, 18, 2)
NUM_HEADS = (4, 8, 16, 32)
MLP_RATIO = 4
IMG_SIZE = 224
PATCH = 4
LN_EPS = 1e-5


@functools.lru_cache(maxsize=None)
def _vmem_limit():
    # generation-aware VMEM ceiling: ~75% of physical (v5e/v6e: 96 MiB, v7x: 48 MiB).
    try:
        cap = pltpu.get_tpu_info().vmem_capacity_bytes
    except Exception:
        cap = 64 * 1024 * 1024
    return int(min(100 * 1024 * 1024, cap * 3 // 4))


# ----------------------------- Pallas kernels ------------------------------

def _mm_kernel(*refs, act, has_ln, has_res):
    """(optional LayerNorm) -> bf16 matmul (f32 acc) -> +bias (-> tanh GELU) (-> +residual)."""
    idx = 0
    x_ref = refs[idx]; idx += 1
    w_ref = refs[idx]; idx += 1
    b_ref = refs[idx]; idx += 1
    if has_ln:
        g_ref = refs[idx]; be_ref = refs[idx + 1]; idx += 2
    if has_res:
        r_ref = refs[idx]; idx += 1
    o_ref = refs[idx]

    x = x_ref[...]
    if has_ln:
        xf = x.astype(jnp.float32)
        mu = jnp.mean(xf, axis=-1, keepdims=True)
        xc = xf - mu
        var = jnp.mean(xc * xc, axis=-1, keepdims=True)
        x = xc * lax.rsqrt(var + LN_EPS) * g_ref[...] + be_ref[...]

    y = jnp.dot(x.astype(jnp.bfloat16), w_ref[...],
                preferred_element_type=jnp.float32)
    y = y + b_ref[...]
    if act == "gelu":
        # tanh approximation routes through the EUP (free VLIW slot) instead of a VPU
        # erf polynomial over the full (tm, tn) f32 tile.
        y = 0.5 * y * (1.0 + jnp.tanh(0.7978845608028654 * (y + 0.044715 * y * y * y)))
    if has_res:
        y = y + r_ref[...].astype(jnp.float32)
    o_ref[...] = y.astype(o_ref.dtype)


def _ln_kernel(x_ref, g_ref, b_ref, o_ref):
    x = x_ref[...].astype(jnp.float32)
    mu = jnp.mean(x, axis=-1, keepdims=True)
    xc = x - mu
    var = jnp.mean(xc * xc, axis=-1, keepdims=True)
    o_ref[...] = (xc * lax.rsqrt(var + LN_EPS) * g_ref[...] + b_ref[...]).astype(o_ref.dtype)


def _attn_kernel(x_ref, w_ref, b_ref, g_ref, be_ref, rel_ref, *rest,
                 wb, heads, hd, has_mask):
    """Fused LN1 + QKV projection + window attention on a block of wb windows.

    x_ref:  (wb, L, C)  bf16 windowed tokens (pre-LN, channels last / lane dense)
    w_ref:  (C, 3C)     bf16 QKV weight (1/sqrt(hd) scale pre-folded into the Q columns)
    b_ref:  (1, 3C) f32, g_ref/be_ref: (1, C) f32 LN1 params
    rel_ref:(heads, L, L) f32 relative-position bias, mask_ref: (wb, L, L) f32 shift mask
    o_ref:  (wb, L, C)  bf16 attention output, written with one lane-dense store.
    qkv_scr:(wb, L, 3C) bf16 VMEM scratch (QKV never round-trips to HBM).
    """
    if has_mask:
        mask_ref, o_ref, qkv_scr = rest
    else:
        o_ref, qkv_scr = rest
    C = heads * hd

    # LayerNorm (f32 math) over the whole window block.
    x = x_ref[...].astype(jnp.float32)                       # (wb, L, C)
    mu = jnp.mean(x, axis=-1, keepdims=True)
    xc = x - mu
    var = jnp.mean(xc * xc, axis=-1, keepdims=True)
    xln = (xc * lax.rsqrt(var + LN_EPS) * g_ref[...] + be_ref[...]).astype(jnp.bfloat16)

    # QKV projection kept in VMEM (per-window 2D MXU matmuls; 3C-wide dense stores).
    wqkv = w_ref[...]
    bqkv = b_ref[...]
    for wi in range(wb):
        qkv = jnp.dot(xln[wi], wqkv, preferred_element_type=jnp.float32) + bqkv
        qkv_scr[wi] = qkv.astype(jnp.bfloat16)

    # Batched-window attention per head; heads are concatenated in registers and the
    # output is written once, lane dense (no 32-lane masked stores).
    outs = []
    for h in range(heads):
        q = qkv_scr[:, :, h * hd:(h + 1) * hd]
        k = qkv_scr[:, :, C + h * hd:C + (h + 1) * hd]
        v = qkv_scr[:, :, 2 * C + h * hd:2 * C + (h + 1) * hd]
        s = jnp.einsum("wqd,wkd->wqk", q, k, preferred_element_type=jnp.float32)
        s = s + rel_ref[h][None, :, :]
        if has_mask:
            s = s + mask_ref[...]
        s = s - jnp.max(s, axis=-1, keepdims=True)
        e = jnp.exp(s)
        a = e * pl.reciprocal(jnp.sum(e, axis=-1, keepdims=True), approx=True)
        o = jnp.einsum("wqk,wkd->wqd", a.astype(jnp.bfloat16), v,
                       preferred_element_type=jnp.float32)
        outs.append(o.astype(jnp.bfloat16))
    o_ref[...] = jnp.concatenate(outs, axis=-1).astype(o_ref.dtype)


# ------------------------- tiling helpers & wrappers -------------------------

def _row_tile(M, cap=1024):
    divs = [t for t in range(8, min(M, cap) + 1, 8) if M % t == 0]
    pref = [t for t in divs if M // t >= 2]      # keep >=2 grid steps for v7x's 2nd TC
    if pref:
        return max(pref)
    return max(divs) if divs else M              # fall back to full M (block == array dim)


def _col_tile(N, m_grid, cap=2048):
    divs = [t for t in range(128, min(N, cap) + 1, 128) if N % t == 0]
    if m_grid < 2:
        # no row parallelism -> force >=2 column tiles when possible (v7x dual TC)
        half = [t for t in divs if N // t >= 2]
        if half:
            return max(half)
    if N <= cap:
        return N                                 # single N tile: LN never recomputed
    return max(divs) if divs else N


def _win_tile(nwin, base, cap=32):
    # wb must divide `base` (nW when a shift mask is used so mask indexing stays valid,
    # nwin otherwise); prefer the largest wb that still leaves >=2 grid steps.
    divs = [d for d in range(1, min(base, cap) + 1) if base % d == 0 and nwin % d == 0]
    pref = [d for d in divs if nwin // d >= 2]
    if pref:
        return max(pref)
    return max(divs) if divs else 1


@functools.lru_cache(maxsize=None)
def _mm_call(M, K, N, act, has_ln, has_res, out_dtype):
    tm = _row_tile(M)
    tn = _col_tile(N, M // tm)
    in_specs = [pl.BlockSpec((tm, K), lambda i, j: (i, 0)),
                pl.BlockSpec((K, tn), lambda i, j: (0, j)),
                pl.BlockSpec((1, tn), lambda i, j: (0, j))]
    if has_ln:
        in_specs += [pl.BlockSpec((1, K), lambda i, j: (0, 0)),
                     pl.BlockSpec((1, K), lambda i, j: (0, 0))]
    if has_res:
        in_specs.append(pl.BlockSpec((tm, tn), lambda i, j: (i, j)))
    fn = pl.pallas_call(
        functools.partial(_mm_kernel, act=act, has_ln=has_ln, has_res=has_res),
        out_shape=jax.ShapeDtypeStruct((M, N), jnp.dtype(out_dtype)),
        grid_spec=pltpu.PrefetchScalarGridSpec(
            num_scalar_prefetch=0,
            grid=(M // tm, N // tn),
            in_specs=in_specs,
            out_specs=pl.BlockSpec((tm, tn), lambda i, j: (i, j))),
        compiler_params=pltpu.CompilerParams(
            dimension_semantics=("parallel", "parallel"),
            vmem_limit_bytes=_vmem_limit()),
    )
    return jax.jit(fn)


def matmul_bias(x, w, b, ln=None, act=None, residual=None, out_dtype=jnp.float32):
    M, K = x.shape
    N = w.shape[1]
    has_ln = ln is not None
    has_res = residual is not None
    fn = _mm_call(M, K, N, act, has_ln, has_res, jnp.dtype(out_dtype).name)
    args = [x, w, b.reshape(1, N)]
    if has_ln:
        args += [ln[0].reshape(1, K), ln[1].reshape(1, K)]
    if has_res:
        args.append(residual)
    return fn(*args)


@functools.lru_cache(maxsize=None)
def _ln_call(M, C, out_dtype):
    tm = _row_tile(M)
    fn = pl.pallas_call(
        _ln_kernel,
        out_shape=jax.ShapeDtypeStruct((M, C), jnp.dtype(out_dtype)),
        grid_spec=pltpu.PrefetchScalarGridSpec(
            num_scalar_prefetch=0,
            grid=(M // tm,),
            in_specs=[pl.BlockSpec((tm, C), lambda i: (i, 0)),
                      pl.BlockSpec((1, C), lambda i: (0, 0)),
                      pl.BlockSpec((1, C), lambda i: (0, 0))],
            out_specs=pl.BlockSpec((tm, C), lambda i: (i, 0))),
        compiler_params=pltpu.CompilerParams(
            dimension_semantics=("parallel",), vmem_limit_bytes=_vmem_limit()),
    )
    return jax.jit(fn)


def layernorm(x, g, b, out_dtype=jnp.float32):
    M, C = x.shape
    return _ln_call(M, C, jnp.dtype(out_dtype).name)(x, g.reshape(1, C), b.reshape(1, C))


@functools.lru_cache(maxsize=None)
def _attn_call(nwin, heads, L, C, wb, n_mask):
    has_mask = n_mask > 0
    hd = C // heads
    in_specs = [
        pl.BlockSpec((wb, L, C), lambda i: (i, 0, 0)),         # windowed tokens (pre-LN)
        pl.BlockSpec((C, 3 * C), lambda i: (0, 0)),            # qkv weight (Q pre-scaled)
        pl.BlockSpec((1, 3 * C), lambda i: (0, 0)),            # qkv bias
        pl.BlockSpec((1, C), lambda i: (0, 0)),                # ln1 gamma
        pl.BlockSpec((1, C), lambda i: (0, 0)),                # ln1 beta
        pl.BlockSpec((heads, L, L), lambda i: (0, 0, 0)),      # rel-pos bias
    ]
    if has_mask:
        nblk = n_mask // wb
        in_specs.append(pl.BlockSpec((wb, L, L), lambda i, _n=nblk: (i % _n, 0, 0)))
    fn = pl.pallas_call(
        functools.partial(_attn_kernel, wb=wb, heads=heads, hd=hd, has_mask=has_mask),
        out_shape=jax.ShapeDtypeStruct((nwin, L, C), jnp.bfloat16),
        grid_spec=pltpu.PrefetchScalarGridSpec(
            num_scalar_prefetch=0,
            grid=(nwin // wb,),
            in_specs=in_specs,
            out_specs=pl.BlockSpec((wb, L, C), lambda i: (i, 0, 0)),
            scratch_shapes=[pltpu.VMEM((wb, L, 3 * C), jnp.bfloat16)]),
        compiler_params=pltpu.CompilerParams(
            dimension_semantics=("parallel",), vmem_limit_bytes=_vmem_limit()),
    )
    return jax.jit(fn)


def window_attention(win_x, blk, mask, heads):
    nwin, L, C = win_x.shape
    qkv_b = blk["qkv_b"].reshape(1, 3 * C)
    g = blk["ln1_g"].reshape(1, C)
    be = blk["ln1_b"].reshape(1, C)
    if mask is not None:
        n_mask = int(mask.shape[0])
        wb = _win_tile(nwin, n_mask)
        fn = _attn_call(nwin, heads, L, C, wb, n_mask)
        return fn(win_x, blk["qkv_w"], qkv_b, g, be, blk["rel_bias"], mask)
    wb = _win_tile(nwin, nwin)
    fn = _attn_call(nwin, heads, L, C, wb, 0)
    return fn(win_x, blk["qkv_w"], qkv_b, g, be, blk["rel_bias"])


# ------------------------------ host-side tables ----------------------------

def _bilinear_matrix(n_in, n_out):
    # PyTorch F.interpolate(mode="bilinear", align_corners=False) source indexing.
    scale = n_in / n_out
    idx = np.arange(n_out)
    src = np.maximum((idx + 0.5) * scale - 0.5, 0.0)
    i0 = np.minimum(np.floor(src).astype(np.int64), n_in - 1)
    i1 = np.minimum(i0 + 1, n_in - 1)
    frac = src - i0
    A = np.zeros((n_out, n_in), np.float32)
    A[idx, i0] += (1.0 - frac)
    A[idx, i1] += frac
    return A


def _relative_position_index(ws):
    coords = np.stack(np.meshgrid(np.arange(ws), np.arange(ws), indexing="ij"))
    flat = coords.reshape(2, -1)
    rel = (flat[:, :, None] - flat[:, None, :]).transpose(1, 2, 0).astype(np.int64)
    rel[:, :, 0] += ws - 1
    rel[:, :, 1] += ws - 1
    rel[:, :, 0] *= 2 * ws - 1
    return rel.sum(-1)                                   # (ws*ws, ws*ws)


def _shift_attn_mask(H, W, ws, shift):
    img = np.zeros((H, W), np.int32)
    cnt = 0
    for hs in (slice(0, -ws), slice(-ws, -shift), slice(-shift, None)):
        for wsl in (slice(0, -ws), slice(-ws, -shift), slice(-shift, None)):
            img[hs, wsl] = cnt
            cnt += 1
    win = img.reshape(H // ws, ws, W // ws, ws).transpose(0, 2, 1, 3).reshape(-1, ws * ws)
    diff = win[:, :, None] - win[:, None, :]
    return np.where(diff != 0, -100.0, 0.0).astype(np.float32)   # (nW, L, L)


# ------------------------------ model pieces --------------------------------

def _window_partition(x, ws):
    B, H, W, C = x.shape
    x = x.reshape(B, H // ws, ws, W // ws, ws, C).transpose(0, 1, 3, 2, 4, 5)
    return x.reshape(B * (H // ws) * (W // ws), ws * ws, C)


def _window_reverse(w, ws, B, H, W):
    C = w.shape[-1]
    x = w.reshape(B, H // ws, W // ws, ws, ws, C).transpose(0, 1, 3, 2, 4, 5)
    return x.reshape(B, H, W, C)


def input_conv(x, wmat, b):
    # Conv2d(in_ch -> 3, k=3, s=1, p=1) via im2col + Pallas matmul.
    B, Cin, H, W = x.shape
    xp = jnp.pad(x, ((0, 0), (0, 0), (1, 1), (1, 1)))
    patches = jnp.stack([xp[:, :, dy:dy + H, dx:dx + W]
                         for dy in range(3) for dx in range(3)], axis=2)   # (B,Cin,9,H,W)
    patches = patches.transpose(0, 3, 4, 1, 2).reshape(B * H * W, Cin * 9)
    y = matmul_bias(patches, wmat, b)                                      # (B*H*W, 3)
    return y.reshape(B, H, W, 3).transpose(0, 3, 1, 2)


def bilinear_resize(x, Ah, Aw):
    # Separable bilinear resize as two Pallas matmuls.
    B, C, Hin, Win = x.shape
    Hout, Wout = Ah.shape[0], Aw.shape[0]
    t = matmul_bias(x.reshape(B * C * Hin, Win), Aw.T, jnp.zeros((Wout,), jnp.float32))
    t = t.reshape(B, C, Hin, Wout).transpose(0, 1, 3, 2).reshape(B * C * Wout, Hin)
    y = matmul_bias(t, Ah.T, jnp.zeros((Hout,), jnp.float32))
    return y.reshape(B, C, Wout, Hout).transpose(0, 1, 3, 2)


def patch_embed(x, p):
    # Conv2d(3 -> embed, k=4, s=4) == non-overlapping patch matmul, then LayerNorm.
    B = x.shape[0]
    Hp = Wp = IMG_SIZE // PATCH
    x = x.reshape(B, 3, Hp, PATCH, Wp, PATCH).transpose(0, 2, 4, 1, 3, 5)
    x = x.reshape(B * Hp * Wp, 3 * PATCH * PATCH)
    y = matmul_bias(x, p["patch_wmat"], p["patch_b"], out_dtype=jnp.bfloat16)
    y = layernorm(y, p["patch_ln_g"], p["patch_ln_b"], out_dtype=jnp.bfloat16)
    return y.reshape(B, Hp * Wp, EMBED_DIM), (Hp, Wp)


def swin_block(x, blk, H, W, heads, shift, shift_mask):
    B, L, C = x.shape
    ws = WINDOW
    # Permute raw tokens into windowed order; LayerNorm / residual commute with the
    # permutation, so LN1+QKV are fused into the attention kernel and the residual is
    # added inside the projection matmul (all in windowed order).
    h = x.reshape(B, H, W, C)
    if shift > 0:
        h = jnp.roll(h, (-shift, -shift), axis=(1, 2))
    win_x = _window_partition(h, ws)                                # (nwin, 49, C) bf16
    nwin, Lw, _ = win_x.shape

    # fused LN1 + QKV (in VMEM) + window attention -> (nwin, 49, C) bf16
    o = window_attention(win_x, blk, shift_mask if shift > 0 else None, heads)

    rows = win_x.reshape(nwin * Lw, C)                              # bf16 residual
    out_win = matmul_bias(o.reshape(nwin * Lw, C), blk["proj_w"], blk["proj_b"],
                          residual=rows, out_dtype=jnp.bfloat16)
    h = _window_reverse(out_win.reshape(nwin, Lw, C), ws, B, H, W)
    if shift > 0:
        h = jnp.roll(h, (shift, shift), axis=(1, 2))
    x = h.reshape(B, L, C)                                          # shortcut + attn (bf16)

    rows2 = x.reshape(B * L, C)
    # fused LN2 + FC1 + GELU -> bf16, then FC2 + fused residual -> bf16
    y = matmul_bias(rows2, blk["fc1_w"], blk["fc1_b"],
                    ln=(blk["ln2_g"], blk["ln2_b"]), act="gelu",
                    out_dtype=jnp.bfloat16)
    x = matmul_bias(y, blk["fc2_w"], blk["fc2_b"], residual=rows2,
                    out_dtype=jnp.bfloat16)
    return x.reshape(B, L, C)


def patch_merge(x, stage, H, W):
    B, L, C = x.shape
    xi = x.reshape(B, H, W, C)
    x0 = xi[:, 0::2, 0::2, :]
    x1 = xi[:, 1::2, 0::2, :]
    x2 = xi[:, 0::2, 1::2, :]
    x3 = xi[:, 1::2, 1::2, :]
    xc = jnp.concatenate([x0, x1, x2, x3], axis=-1).reshape(B * (H // 2) * (W // 2), 4 * C)
    # fused LN + reduction matmul (no bias)
    y = matmul_bias(xc, stage["merge_w"], jnp.zeros((2 * C,), jnp.float32),
                    ln=(stage["merge_ln_g"], stage["merge_ln_b"]),
                    out_dtype=jnp.bfloat16)
    return y.reshape(B, (H // 2) * (W // 2), 2 * C), (H // 2, W // 2)


def swin_encoder_forward(x, params):
    B = x.shape[0]
    if x.shape[1] != 3:                                   # nn.Identity() when in_channels == 3
        x = input_conv(x, params["conv_wmat"], params["conv_b"])
    Ah = jnp.asarray(_bilinear_matrix(x.shape[2], IMG_SIZE), jnp.bfloat16)
    Aw = jnp.asarray(_bilinear_matrix(x.shape[3], IMG_SIZE), jnp.bfloat16)
    x = bilinear_resize(x, Ah, Aw)                        # (B, 3, 224, 224)

    tokens, (H, W) = patch_embed(x, params)               # bf16 tokens

    hidden_states = []
    for si, stage in enumerate(params["stages"]):
        heads = NUM_HEADS[si]
        shiftable = min(H, W) > WINDOW
        shift_mask = (jnp.asarray(_shift_attn_mask(H, W, WINDOW, WINDOW // 2))
                      if shiftable else None)
        for bi, blk in enumerate(stage["blocks"]):
            shift = WINDOW // 2 if (bi % 2 == 1 and shiftable) else 0
            tokens = swin_block(tokens, blk, H, W, heads, shift,
                                shift_mask if shift > 0 else None)
        if "merge_w" in stage:
            tokens, (H, W) = patch_merge(tokens, stage, H, W)
        hidden_states.append(tokens)

    final = layernorm(tokens.reshape(-1, tokens.shape[-1]),
                      params["final_ln_g"], params["final_ln_b"],
                      out_dtype=jnp.float32).reshape(tokens.shape)

    def to_nchw(state):
        b, L, c = state.shape
        hw = int(math.isqrt(L))
        return state.astype(jnp.float32).transpose(0, 2, 1).reshape(b, c, hw, hw)

    reshaped = [to_nchw(s) for s in hidden_states[-4:]]
    return reshaped, to_nchw(final)


# ------------------------------- parameters ---------------------------------

def _normal(key, shape, std=0.02):
    return std * jax.random.normal(key, shape, jnp.float32)


def init_params(key, in_channels):
    keys = iter(jax.random.split(key, 64))
    nk = lambda: next(keys)
    bf = jnp.bfloat16
    rel_index = jnp.asarray(_relative_position_index(WINDOW))        # (49, 49)
    p = {
        "conv_wmat": _normal(nk(), (3, in_channels, 3, 3)).reshape(3, -1).T.astype(bf),
        "conv_b": jnp.zeros((3,), jnp.float32),
        "patch_wmat": _normal(nk(), (EMBED_DIM, 3, PATCH, PATCH))
                      .reshape(EMBED_DIM, -1).T.astype(bf),
        "patch_b": jnp.zeros((EMBED_DIM,), jnp.float32),
        "patch_ln_g": jnp.ones((EMBED_DIM,), jnp.float32),
        "patch_ln_b": jnp.zeros((EMBED_DIM,), jnp.float32),
    }
    stages = []
    dim = EMBED_DIM
    for si, (depth, heads) in enumerate(zip(DEPTHS, NUM_HEADS)):
        blocks = []
        # fold the 1/sqrt(head_dim) attention scale into the Q columns of the QKV
        # projection (weights AND bias) so the kernel never multiplies the score tensor.
        scale = 1.0 / math.sqrt(dim // heads)
        qcol = jnp.concatenate([jnp.full((dim,), scale, jnp.float32),
                                jnp.ones((2 * dim,), jnp.float32)])
        for _ in range(depth):
            rel_tbl = _normal(nk(), ((2 * WINDOW - 1) ** 2, heads))
            # precompute (heads, 49, 49) relative-position bias once (hoisted from forward)
            rel_bias = rel_tbl[rel_index].transpose(2, 0, 1)
            blocks.append({
                "ln1_g": jnp.ones((dim,), jnp.float32),
                "ln1_b": jnp.zeros((dim,), jnp.float32),
                "qkv_w": (_normal(nk(), (dim, 3 * dim)) * qcol[None, :]).astype(bf),
                "qkv_b": jnp.zeros((3 * dim,), jnp.float32) * qcol,   # zeros; scaled for generality
                "rel_bias": rel_bias,
                "proj_w": _normal(nk(), (dim, dim)).astype(bf),
                "proj_b": jnp.zeros((dim,), jnp.float32),
                "ln2_g": jnp.ones((dim,), jnp.float32),
                "ln2_b": jnp.zeros((dim,), jnp.float32),
                "fc1_w": _normal(nk(), (dim, MLP_RATIO * dim)).astype(bf),
                "fc1_b": jnp.zeros((MLP_RATIO * dim,), jnp.float32),
                "fc2_w": _normal(nk(), (MLP_RATIO * dim, dim)).astype(bf),
                "fc2_b": jnp.zeros((dim,), jnp.float32),
            })
        stage = {"blocks": blocks}
        if si < len(DEPTHS) - 1:
            stage["merge_ln_g"] = jnp.ones((4 * dim,), jnp.float32)
            stage["merge_ln_b"] = jnp.zeros((4 * dim,), jnp.float32)
            stage["merge_w"] = _normal(nk(), (4 * dim, 2 * dim)).astype(bf)
            dim = 2 * dim
        stages.append(stage)
    p["stages"] = stages
    p["final_ln_g"] = jnp.ones((dim,), jnp.float32)
    p["final_ln_b"] = jnp.zeros((dim,), jnp.float32)
    return p


# ---------------------------------- main -------------------------------------

if __name__ == "__main__":
    B, Cin, Hs, Ws = 2, 1, 16, 16                # in_channels=1 default of SwinEncoder
    x = jax.random.normal(jax.random.PRNGKey(0), (B, Cin, Hs, Ws), jnp.float32)
    params = init_params(jax.random.PRNGKey(1), Cin)

    forward = jax.jit(swin_encoder_forward)
    hidden, final = forward(x, params)
    final = jax.block_until_ready(final)
    hidden = [jax.block_until_ready(h) for h in hidden]

    assert final.shape == (B, 1024, 7, 7), final.shape
    expected = [(B, 256, 28, 28), (B, 512, 14, 14), (B, 1024, 7, 7), (B, 1024, 7, 7)]
    assert [tuple(h.shape) for h in hidden] == expected, [h.shape for h in hidden]
    assert bool(jnp.isfinite(final).all())
    print("KERNEL_OK")
</pallas_src>

<mosaic_0001>
module attributes {stable_mosaic.version = 11 : i64} {
  func.func @_mm_kernel(%arg0: i32, %arg1: i32, %arg2: memref<256x9xf32, #tpu.memory_space<vmem>>, %arg3: memref<9x3xbf16, #tpu.memory_space<vmem>>, %arg4: memref<1x3xf32, #tpu.memory_space<vmem>>, %arg5: memref<256x3xf32, #tpu.memory_space<vmem>>) attributes {dimension_semantics = [#tpu.dimension_semantics<parallel>, #tpu.dimension_semantics<parallel>], iteration_bounds = array<i64: 2, 1>, scalar_prefetch = 0 : i64, scratch_operands = 0 : i64, tpu.core_type = #tpu.core_type<tc>, window_params = [{transform_indices = @transform_0, window_bounds = array<i64: 256, 9>}, {transform_indices = @transform_1, window_bounds = array<i64: 9, 3>}, {transform_indices = @transform_2, window_bounds = array<i64: 1, 3>}, {transform_indices = @transform_3, window_bounds = array<i64: 256, 3>}]} {
    %c0 = arith.constant 0 : index
    %c0_0 = arith.constant 0 : index
    %0 = vector.load %arg2[%c0, %c0_0] : memref<256x9xf32, #tpu.memory_space<vmem>>, vector<256x9xf32>
    %1 = arith.truncf %0 : vector<256x9xf32> to vector<256x9xbf16>
    %c0_1 = arith.constant 0 : index
    %c0_2 = arith.constant 0 : index
    %2 = vector.load %arg3[%c0_1, %c0_2] : memref<9x3xbf16, #tpu.memory_space<vmem>>, vector<9x3xbf16>
    %cst = arith.constant dense<0.000000e+00> : vector<256x3xf32>
    %3 = tpu.matmul %1, %2, %cst {dimension_numbers = #tpu.dot_dimension_numbers<[1], [0], [0], [1], [0, 0, 1, 1], [], []>} : vector<256x9xbf16>, vector<9x3xbf16>, vector<256x3xf32> -> vector<256x3xf32>
    %c0_3 = arith.constant 0 : index
    %c0_4 = arith.constant 0 : index
    %4 = vector.load %arg4[%c0_3, %c0_4] : memref<1x3xf32, #tpu.memory_space<vmem>>, vector<1x3xf32>
    %5 = vector.broadcast %4 : vector<1x3xf32> to vector<256x3xf32>
    %6 = arith.addf %3, %5 : vector<256x3xf32>
    %c0_5 = arith.constant 0 : index
    %c0_6 = arith.constant 0 : index
    %7 = vector.load %arg5[%c0_5, %c0_6] : memref<256x3xf32, #tpu.memory_space<vmem>>, vector<256x3xf32>
    tpu.vector_store %arg5[%c0_5, %c0_6], %6 {strides = array<i32>} : memref<256x3xf32, #tpu.memory_space<vmem>>, vector<256x3xf32>,
    return
  }
  func.func @transform_0(%arg0: i32, %arg1: i32) -> (i32, i32) {
    %c0_i32 = arith.constant 0 : i32
    %c0_i32_0 = arith.constant 0 : i32
    return %arg0, %c0_i32 : i32, i32
  }
  func.func @transform_1(%arg0: i32, %arg1: i32) -> (i32, i32) {
    %c0_i32 = arith.constant 0 : i32
    %c0_i32_0 = arith.constant 0 : i32
    return %c0_i32, %arg1 : i32, i32
  }
  func.func @transform_2(%arg0: i32, %arg1: i32) -> (i32, i32) {
    %c0_i32 = arith.constant 0 : i32
    %c0_i32_0 = arith.constant 0 : i32
    return %c0_i32, %arg1 : i32, i32
  }
  func.func @transform_3(%arg0: i32, %arg1: i32) -> (i32, i32) {
    %c0_i32 = arith.constant 0 : i32
    return %arg0, %arg1 : i32, i32
  }
}

</mosaic_0001>

<bundles_post_ra>
// kernel: tpu_custom_call.1
= control target key start
LH: loop header
LB: loop body
LE: loop exit
PB: predicated region body
PF: predicated region fallthrough
CT: control target
= control target key end

     0   :  { %s795_s12 = smov 0   ;;  %s797_s13 = smov 0   ;;  %s991_s0 = inlined_call_operand.vmem [shape: f32[512,9], index: 0, kind: input, shape index: {}]   ;;  %s992_s1 = inlined_call_operand.vmem [shape: bf16[9,3], index: 1, kind: input, shape index: {}]   ;;  %s993_s2 = inlined_call_operand.vmem [shape: f32[1,3], index: 2, kind: input, shape index: {}]   ;;  %s994_s3 = inlined_call_operand.vmem [shape: f32[512,3], index: 3, kind: output, shape index: {}]  }
   0x1   :  { %s799_s14 = smov 0  }
   0x2 LB: > { %s25_s15 = sadd.s32 1, %s768_s13  ;;  %p646_p0 = scmp.ge.s32.totalorder %s772_s14, 1  ;;  %s772_s14 = sphi %s799_s14, %s13_s14   ;;  %s768_s13 = sphi %s797_s13, %s996_s13   ;;  %s764_s12 = sphi %s795_s12, %s995_s12  }
   0x3   : > { %p27_p1 = scmp.ge.s32.totalorder %s25_s15, 2  ;;  %p169_p2 = scmp.lt.s32.totalorder %s772_s14, 3 }
   0x5   : > { %s998_s15 = smov (%p27_p1, %s25_s15), 0  ;;  %p170_p3 = pnand %p646_p0, %p169_p2 }
   0x6   : > { %s647_s18 = sshll.u32 (!%p170_p3), %s764_s12, 5 }
   0x7   : > { %173 = sbr.rel (%p170_p3) target bundleno = 247 (0xf7), region = 32  ;;  %p204_p4 = scmp.lt.s32.totalorder (!%p170_p3), %s647_s18, 63 }
   0xc   : > { %v749_v0 = vld [vmem:[%s992_s1] sm:$0x1f]   ;;  %vm337_vm0 = vcmask 1043456   ;;  %vm338_vm1 = vcmask 1044480   ;;  %v774_v1 = vmov 65535   ;;  %s1000_s18 = smov (!%p204_p4, %s647_s18), 63 }
   0xd   : > { %v339_v2 = vsel %vm337_vm0, 4294967295, %v774_v1  ;;  %s648_s19 = sshll.u32 %s1000_s18, 3  ;;  %vm288_vm2 = vcmask 72704   ;;  %v877_v53 = vld [vmem:[%s993_s2] ss:$0 sm:$0xff]  ;;  %vm505_vm3 = vcmask 23552  }
   0xe   : > { %v340_v3 = vsel %vm338_vm1, %v339_v2, 0  ;;  %s824_s22 = scalar_lea.vmem %s991_s0, %s648_s19  ;;  %s884_s27 = scalar_lea.vmem %s994_s3, %s648_s19 }
   0xf   : > { %v342_v4 = vand.u32 %v749_v0, %v340_v3  ;;  %v226_v5 = vld [vmem:[%s824_s22] sm:$0xff]  ;;  %v227_v6 = vld [vmem:[%s824_s22 + $0x8] sm:$0xff]  ;;  %v228_v10 = vld [vmem:[%s824_s22 + $0x10] sm:$0xff] }
  0x10   : > { %v242_v7 = vld [vmem:[%s824_s22 + $0x80] sm:$0xff]  ;;  %v258_v8 = vpack.c.bf16 %v227_v6, %v226_v5  ;;  %v243_v9 = vld [vmem:[%s824_s22 + $0x88] sm:$0xff]  ;;  %v229_v11 = vld [vmem:[%s824_s22 + $0x18] sm:$0xff] }
  0x11   : > { %688 = vmatprep.subr.bf16.mxu0 %v342_v4  ;;  %722 = vmatprep.subr.bf16.mxu1 %v342_v4  ;;  %v266_v12 = vpack.c.bf16 %v243_v9, %v242_v7  ;;  %v259_v13 = vpack.c.bf16 %v229_v11, %v228_v10  ;;  %v244_v14 = vld [vmem:[%s824_s22 + $0x90] sm:$0xff]  ;;  %v245_v15 = vld [vmem:[%s824_s22 + $0x98] sm:$0xff]  ;;  %v230_v16 = vld [vmem:[%s824_s22 + $0x20] sm:$0xff] }
  0x12   : > { %689 = vmatpush3.bf16.msra.mxu0 %v342_v4  ;;  %723 = vmatpush3.bf16.msra.mxu1 %v342_v4  ;;  %v267_v17 = vpack.c.bf16 %v245_v15, %v244_v14  ;;  %v231_v18 = vld [vmem:[%s824_s22 + $0x28] sm:$0xff]  ;;  %v246_v19 = vld [vmem:[%s824_s22 + $0xa0] sm:$0xff]  ;;  %v232_v23 = vld [vmem:[%s824_s22 + $0x30] sm:$0xff] }
  0x13   : > { %690 = vmatprep.mubr.msk.bf16.mxu0 %vm288_vm2, %v258_v8  ;;  %v247_v20 = vld [vmem:[%s824_s22 + $0xa8] sm:$0xff]  ;;  %706 = vmatprep.mubr.msk.bf16.mxu1 %vm288_vm2, %v266_v12  ;;  %v260_v21 = vpack.c.bf16 %v231_v18, %v230_v16  ;;  %v233_v24 = vld [vmem:[%s824_s22 + $0x38] sm:$0xff]  ;;  %v248_v25 = vld [vmem:[%s824_s22 + $0xb0] sm:$0xff] }
  0x14   : > { %v268_v22 = vpack.c.bf16 %v247_v20, %v246_v19  ;;  %v249_v26 = vld [vmem:[%s824_s22 + $0xb8] sm:$0xff]  ;;  %v234_v27 = vld [vmem:[%s824_s22 + $0x40] sm:$0xff]  ;;  %v235_v28 = vld [vmem:[%s824_s22 + $0x48] sm:$0xff]  ;;  %v261_v31 = vpack.c.bf16 %v233_v24, %v232_v23 }
  0x15   : > { %691 = vmatmul.mubr.msk.bf16.vlgmr.msra.gmra.mxu0 %vm288_vm2, %v259_v13  ;;  %707 = vmatmul.mubr.msk.bf16.vlgmr.msra.gmra.mxu1 %vm288_vm2, %v267_v17  ;;  %v250_v29 = vld [vmem:[%s824_s22 + $0xc0] sm:$0xff]  ;;  %v251_v30 = vld [vmem:[%s824_s22 + $0xc8] sm:$0xff]  ;;  %v269_v32 = vpack.c.bf16 %v249_v26, %v248_v25  ;;  %v262_v33 = vpack.c.bf16 %v235_v28, %v234_v27  ;;  %v236_v35 = vld [vmem:[%s824_s22 + $0x50] sm:$0xff] }
  0x16   : > { %694 = vmatprep.mubr.msk.bf16.mxu0 %vm288_vm2, %v260_v21  ;;  %710 = vmatprep.mubr.msk.bf16.mxu1 %vm288_vm2, %v268_v22  ;;  %v270_v34 = vpack.c.bf16 %v251_v30, %v250_v29  ;;  %v237_v36 = vld [vmem:[%s824_s22 + $0x58] sm:$0xff]  ;;  %v252_v37 = vld [vmem:[%s824_s22 + $0xd0] sm:$0xff]  ;;  %v238_v39 = vld [vmem:[%s824_s22 + $0x60] sm:$0xff] }
  0x17   : > { %v253_v38 = vld [vmem:[%s824_s22 + $0xd8] sm:$0xff]  ;;  %v239_v40 = vld [vmem:[%s824_s22 + $0x68] sm:$0xff]  ;;  %v254_v41 = vld [vmem:[%s824_s22 + $0xe0] sm:$0xff]  ;;  %v263_v43 = vpack.c.bf16 %v237_v36, %v236_v35 }
  0x18   : > { %v255_v42 = vld [vmem:[%s824_s22 + $0xe8] sm:$0xff]  ;;  %v271_v44 = vpack.c.bf16 %v253_v38, %v252_v37  ;;  %v264_v45 = vpack.c.bf16 %v239_v40, %v238_v39  ;;  %v240_v47 = vld [vmem:[%s824_s22 + $0x70] sm:$0xff]  ;;  %v241_v48 = vld [vmem:[%s824_s22 + $0x78] sm:$0xff] }
  0x19   : > { %v272_v46 = vpack.c.bf16 %v255_v42, %v254_v41  ;;  %v256_v49 = vld [vmem:[%s824_s22 + $0xf0] sm:$0xff]  ;;  %v257_v50 = vld [vmem:[%s824_s22 + $0xf8] sm:$0xff]  ;;  %v265_v51 = vpack.c.bf16 %v241_v48, %v240_v47 }
  0x1a   : > { %v273_v52 = vpack.c.bf16 %v257_v50, %v256_v49 }
  0x1d   : > { %695 = vmatmul.mubr.msk.bf16.gmra.mxu0 %vm288_vm2, %v261_v31  ;;  %711 = vmatmul.mubr.msk.bf16.gmra.mxu1 %vm288_vm2, %v269_v32 }
  0x1e   : > { %698 = vmatprep.mubr.msk.bf16.mxu0 %vm288_vm2, %v262_v33  ;;  %714 = vmatprep.mubr.msk.bf16.mxu1 %vm288_vm2, %v270_v34 }
  0x25   : > { %699 = vmatmul.mubr.msk.bf16.gmra.mxu0 %vm288_vm2, %v263_v43  ;;  %715 = vmatmul.mubr.msk.bf16.gmra.mxu1 %vm288_vm2, %v271_v44 }
  0x26   : > { %702 = vmatprep.mubr.msk.bf16.mxu0 %vm288_vm2, %v264_v45  ;;  %718 = vmatprep.mubr.msk.bf16.mxu1 %vm288_vm2, %v272_v46 }
  0x2d   : > { %703 = vmatmul.mubr.msk.bf16.gmra.mxu0 %vm288_vm2, %v265_v51  ;;  %719 = vmatmul.mubr.msk.bf16.gmra.mxu1 %vm288_vm2, %v273_v52 }
  0xd5   : > { %v692_v54 = vpop.f32.mrf.mxu0  ;;  %v708_v56 = vpop.f32.mrf.mxu1 }
  0xd6   : > { %v387_v55 = vadd.f32 %v692_v54, %v877_v53  ;;  %v451_v57 = vadd.f32 %v708_v56, %v877_v53 }
  0xd7   : > { %v378_v58 = vpop.f32.mrf.mxu0  ;;  %v442_v60 = vpop.f32.mrf.mxu1 }
  0xd8   : > { %508 = vst.msk [vmem:[%s884_s27 + $0x10] sm:$0xff] %vm505_vm3, %v387_v55  ;;  %v379_v59 = vadd.f32 %v877_v53, %v378_v58  ;;  %524 = vst.msk [vmem:[%s884_s27 + $0x90] sm:$0xff] %vm505_vm3, %v451_v57  ;;  %v443_v61 = vadd.f32 %v877_v53, %v442_v60 }
  0xd9   : > { %v693_v62 = vpop.f32.mrf.mxu0  ;;  %v709_v0 = vpop.f32.mrf.mxu1 }
  0xda   : > { %506 = vst.msk [vmem:[%s884_s27] sm:$0xff] %vm505_vm3, %v379_v59  ;;  %v390_v63 = vadd.f32 %v693_v62, %v877_v53  ;;  %522 = vst.msk [vmem:[%s884_s27 + $0x80] sm:$0xff] %vm505_vm3, %v443_v61  ;;  %v454_v1 = vadd.f32 %v709_v0, %v877_v53 }
  0xdb   : > { %v381_v2 = vpop.f32.mrf.mxu0  ;;  %v445_v4 = vpop.f32.mrf.mxu1 }
  0xdc   : > { %509 = vst.msk [vmem:[%s884_s27 + $0x18] sm:$0xff] %vm505_vm3, %v390_v63  ;;  %v382_v3 = vadd.f32 %v877_v53, %v381_v2  ;;  %525 = vst.msk [vmem:[%s884_s27 + $0x98] sm:$0xff] %vm505_vm3, %v454_v1  ;;  %v446_v5 = vadd.f32 %v877_v53, %v445_v4 }
  0xdd   : > { %v696_v6 = vpop.f32.mrf.mxu0  ;;  %v712_v8 = vpop.f32.mrf.mxu1 }
  0xde   : > { %507 = vst.msk [vmem:[%s884_s27 + $0x8] sm:$0xff] %vm505_vm3, %v382_v3  ;;  %v403_v7 = vadd.f32 %v696_v6, %v877_v53  ;;  %523 = vst.msk [vmem:[%s884_s27 + $0x88] sm:$0xff] %vm505_vm3, %v446_v5  ;;  %v467_v9 = vadd.f32 %v712_v8, %v877_v53 }
  0xdf   : > { %v394_v10 = vpop.f32.mrf.mxu0  ;;  %v458_v12 = vpop.f32.mrf.mxu1 }
  0xe0   : > { %512 = vst.msk [vmem:[%s884_s27 + $0x30] sm:$0xff] %vm505_vm3, %v403_v7  ;;  %v395_v11 = vadd.f32 %v877_v53, %v394_v10  ;;  %528 = vst.msk [vmem:[%s884_s27 + $0xb0] sm:$0xff] %vm505_vm3, %v467_v9  ;;  %v459_v13 = vadd.f32 %v877_v53, %v458_v12 }
  0xe1   : > { %v697_v14 = vpop.f32.mrf.mxu0  ;;  %v713_v16 = vpop.f32.mrf.mxu1 }
  0xe2   : > { %510 = vst.msk [vmem:[%s884_s27 + $0x20] sm:$0xff] %vm505_vm3, %v395_v11  ;;  %v406_v15 = vadd.f32 %v697_v14, %v877_v53  ;;  %526 = vst.msk [vmem:[%s884_s27 + $0xa0] sm:$0xff] %vm505_vm3, %v459_v13  ;;  %v470_v17 = vadd.f32 %v713_v16, %v877_v53 }
  0xe3   : > { %v397_v18 = vpop.f32.mrf.mxu0  ;;  %v461_v20 = vpop.f32.mrf.mxu1 }
  0xe4   : > { %513 = vst.msk [vmem:[%s884_s27 + $0x38] sm:$0xff] %vm505_vm3, %v406_v15  ;;  %v398_v19 = vadd.f32 %v877_v53, %v397_v18  ;;  %529 = vst.msk [vmem:[%s884_s27 + $0xb8] sm:$0xff] %vm505_vm3, %v470_v17  ;;  %v462_v21 = vadd.f32 %v877_v53, %v461_v20 }
  0xe5   : > { %v700_v22 = vpop.f32.mrf.mxu0  ;;  %v716_v24 = vpop.f32.mrf.mxu1 }
  0xe6   : > { %511 = vst.msk [vmem:[%s884_s27 + $0x28] sm:$0xff] %vm505_vm3, %v398_v19  ;;  %v419_v23 = vadd.f32 %v700_v22, %v877_v53  ;;  %527 = vst.msk [vmem:[%s884_s27 + $0xa8] sm:$0xff] %vm505_vm3, %v462_v21  ;;  %v483_v25 = vadd.f32 %v716_v24, %v877_v53 }
  0xe7   : > { %v410_v26 = vpop.f32.mrf.mxu0  ;;  %v474_v28 = vpop.f32.mrf.mxu1 }
  0xe8   : > { %516 = vst.msk [vmem:[%s884_s27 + $0x50] sm:$0xff] %vm505_vm3, %v419_v23  ;;  %v411_v27 = vadd.f32 %v877_v53, %v410_v26  ;;  %532 = vst.msk [vmem:[%s884_s27 + $0xd0] sm:$0xff] %vm505_vm3, %v483_v25  ;;  %v475_v29 = vadd.f32 %v877_v53, %v474_v28 }
  0xe9   : > { %v701_v30 = vpop.f32.mrf.mxu0  ;;  %v717_v32 = vpop.f32.mrf.mxu1 }
  0xea   : > { %514 = vst.msk [vmem:[%s884_s27 + $0x40] sm:$0xff] %vm505_vm3, %v411_v27  ;;  %v422_v31 = vadd.f32 %v701_v30, %v877_v53  ;;  %530 = vst.msk [vmem:[%s884_s27 + $0xc0] sm:$0xff] %vm505_vm3, %v475_v29  ;;  %v486_v33 = vadd.f32 %v717_v32, %v877_v53 }
  0xeb   : > { %v413_v34 = vpop.f32.mrf.mxu0  ;;  %v477_v36 = vpop.f32.mrf.mxu1 }
  0xec   : > { %517 = vst.msk [vmem:[%s884_s27 + $0x58] sm:$0xff] %vm505_vm3, %v422_v31  ;;  %v414_v35 = vadd.f32 %v877_v53, %v413_v34  ;;  %533 = vst.msk [vmem:[%s884_s27 + $0xd8] sm:$0xff] %vm505_vm3, %v486_v33  ;;  %v478_v37 = vadd.f32 %v877_v53, %v477_v36 }
  0xed   : > { %v704_v38 = vpop.f32.mrf.mxu0  ;;  %v720_v40 = vpop.f32.mrf.mxu1 }
  0xee   : > { %515 = vst.msk [vmem:[%s884_s27 + $0x48] sm:$0xff] %vm505_vm3, %v414_v35  ;;  %v435_v39 = vadd.f32 %v704_v38, %v877_v53  ;;  %531 = vst.msk [vmem:[%s884_s27 + $0xc8] sm:$0xff] %vm505_vm3, %v478_v37  ;;  %v499_v41 = vadd.f32 %v720_v40, %v877_v53 }
  0xef   : > { %v426_v42 = vpop.f32.mrf.mxu0  ;;  %v490_v44 = vpop.f32.mrf.mxu1 }
  0xf0   : > { %520 = vst.msk [vmem:[%s884_s27 + $0x70] sm:$0xff] %vm505_vm3, %v435_v39  ;;  %v427_v43 = vadd.f32 %v877_v53, %v426_v42  ;;  %536 = vst.msk [vmem:[%s884_s27 + $0xf0] sm:$0xff] %vm505_vm3, %v499_v41  ;;  %v491_v45 = vadd.f32 %v877_v53, %v490_v44 }
  0xf1   : > { %v705_v46 = vpop.f32.mrf.mxu0  ;;  %v721_v48 = vpop.f32.mrf.mxu1 }
  0xf2   : > { %518 = vst.msk [vmem:[%s884_s27 + $0x60] sm:$0xff] %vm505_vm3, %v427_v43  ;;  %v438_v47 = vadd.f32 %v705_v46, %v877_v53  ;;  %534 = vst.msk [vmem:[%s884_s27 + $0xe0] sm:$0xff] %vm505_vm3, %v491_v45  ;;  %v502_v49 = vadd.f32 %v721_v48, %v877_v53 }
  0xf3   : > { %v429_v50 = vpop.f32.mrf.mxu0  ;;  %v493_v52 = vpop.f32.mrf.mxu1 }
  0xf4   : > { %521 = vst.msk [vmem:[%s884_s27 + $0x78] sm:$0xff] %vm505_vm3, %v438_v47  ;;  %v430_v51 = vadd.f32 %v877_v53, %v429_v50  ;;  %537 = vst.msk [vmem:[%s884_s27 + $0xf8] sm:$0xff] %vm505_vm3, %v502_v49  ;;  %v494_v54 = vadd.f32 %v877_v53, %v493_v52 }
  0xf6   : > { %519 = vst.msk [vmem:[%s884_s27 + $0x68] sm:$0xff] %vm505_vm3, %v430_v51  ;;  %535 = vst.msk [vmem:[%s884_s27 + $0xe8] sm:$0xff] %vm505_vm3, %v494_v54 }
  0xf7 PF: > { %s13_s14 = sadd.s32 1, %s772_s14   ;;  %s995_s12 = smov %s768_s13 }
  0xf8   : > { %p10_p5 = scmp.ge.s32.totalorder %s13_s14, 4   ;;  %s996_s13 = smov %s998_s15 }
  0xfa   :  { %12 = sbr.rel (!%p10_p5) target bundleno = 2 (0x2), region = 68 }

</bundles_post_ra>
